<compile_context>
chip_gen: v7x
topology: tpu7x:2x2x1
jax: 0.10.0
libtpu: 0.0.40
codegen_flags: <defaults>
</compile_context>

<pallas_src>
import jax
import jax.numpy as jnp
from jax.experimental import pallas as pl
from jax.experimental.pallas import tpu as pltpu

STATE_DIM = 3
ACTION_DIM = 3
IN_DIM = STATE_DIM + ACTION_DIM   # 6
HIDDEN = 100                      # logical hidden size (matches the nn.Module)
HIDDEN_PAD = 128                  # lane-padded hidden size used inside the kernel
LANE = 128
TB_MAX = 4096                     # max batch rows (lanes) per grid step


def _round_up(x, m):
    return ((x + m - 1) // m) * m


def _mlp_kernel(x_ref, w1_ref, b1_ref, w2_ref, b2_ref, w3_ref, b3_ref, o_ref):
    # Feature-major hot path: 3 MXU matmuls + 2 VPU ReLUs on a lane-dense tile.
    x = x_ref[...]                                                   # (6, tb)
    h1 = jnp.dot(w1_ref[...], x, preferred_element_type=jnp.float32) + b1_ref[...]
    h1 = jnp.maximum(h1, 0.0)                                        # (128, tb)
    h2 = jnp.dot(w2_ref[...], h1, preferred_element_type=jnp.float32) + b2_ref[...]
    h2 = jnp.maximum(h2, 0.0)                                        # (128, tb)
    out = jnp.dot(w3_ref[...], h2, preferred_element_type=jnp.float32) + b3_ref[...]
    o_ref[...] = out.astype(o_ref.dtype)                             # (3, tb)


@jax.jit
def absolute_dynamics_forward(state, action, prepared_params):
    """state: (..., STATE_DIM), action: (..., ACTION_DIM) -> (..., STATE_DIM).

    `prepared_params` comes from `prepare_params(init_params(...))`.
    """
    w1t, b1t, w2t, b2t, w3t, b3t = prepared_params
    lead_shape = state.shape[:-1]

    s2d = state.reshape(-1, STATE_DIM).astype(jnp.float32)
    a2d = action.reshape(-1, ACTION_DIM).astype(jnp.float32)
    b = s2d.shape[0]

    # Pack + transpose once in the wrapper: (6, b) feature-major, batch on lanes.
    xT = jnp.concatenate([s2d, a2d], axis=-1).T                      # (6, b)

    # Batch tile (lane dim): either the full batch, a >=2-way lane-aligned
    # split (so both v7x TensorCores get work), or TB_MAX for big batches.
    if b > TB_MAX:
        tb = TB_MAX
    elif b > 2 * LANE:
        tb = _round_up((b + 1) // 2, LANE)   # >= 2 grid steps, lane-aligned
    else:
        tb = b                               # single full-extent tile
    grid = (pl.cdiv(b, tb),)

    # Note: for tiny batches (a few hundred rows) plain XLA may beat the fixed
    # pallas_call cost; a dispatch policy could be added in the caller.
    flops = 2 * b * (IN_DIM * HIDDEN_PAD + HIDDEN_PAD * HIDDEN_PAD
                     + HIDDEN_PAD * STATE_DIM)
    bytes_accessed = 4 * (
        b * (IN_DIM + STATE_DIM)
        + HIDDEN_PAD * IN_DIM + HIDDEN_PAD * HIDDEN_PAD + HIDDEN_PAD * STATE_DIM
        + 2 * HIDDEN_PAD + STATE_DIM)

    outT = pl.pallas_call(
        _mlp_kernel,
        out_shape=jax.ShapeDtypeStruct((STATE_DIM, b), jnp.float32),
        grid_spec=pltpu.PrefetchScalarGridSpec(
            num_scalar_prefetch=0,
            grid=grid,
            in_specs=[
                pl.BlockSpec((IN_DIM, tb), lambda i: (0, i)),            # x^T tile
                pl.BlockSpec((HIDDEN_PAD, IN_DIM), lambda i: (0, 0)),    # W1^T
                pl.BlockSpec((HIDDEN_PAD, 1), lambda i: (0, 0)),         # b1
                pl.BlockSpec((HIDDEN_PAD, HIDDEN_PAD), lambda i: (0, 0)),  # W2^T
                pl.BlockSpec((HIDDEN_PAD, 1), lambda i: (0, 0)),         # b2
                pl.BlockSpec((STATE_DIM, HIDDEN_PAD), lambda i: (0, 0)),  # W3^T
                pl.BlockSpec((STATE_DIM, 1), lambda i: (0, 0)),          # b3
            ],
            out_specs=pl.BlockSpec((STATE_DIM, tb), lambda i: (0, i)),
        ),
        compiler_params=pltpu.CompilerParams(
            dimension_semantics=("parallel",),
            vmem_limit_bytes=32 * 1024 * 1024,
        ),
        cost_estimate=pl.CostEstimate(
            flops=flops, transcendentals=0, bytes_accessed=bytes_accessed),
    )(xT, w1t, b1t, w2t, b2t, w3t, b3t)

    return outT.T.reshape(lead_shape + (STATE_DIM,))


def init_params(key):
    """Deterministic synthetic parameters in module layout.

    Weights are (in_features, out_features); biases are (out_features,).
    """
    k1, k2, k3, k4, k5, k6 = jax.random.split(key, 6)
    w1 = jax.random.normal(k1, (IN_DIM, HIDDEN), jnp.float32) * 0.1
    b1 = jax.random.normal(k2, (HIDDEN,), jnp.float32) * 0.1
    w2 = jax.random.normal(k3, (HIDDEN, HIDDEN), jnp.float32) * 0.1
    b2 = jax.random.normal(k4, (HIDDEN,), jnp.float32) * 0.1
    w3 = jax.random.normal(k5, (HIDDEN, STATE_DIM), jnp.float32) * 0.1
    b3 = jax.random.normal(k6, (STATE_DIM,), jnp.float32) * 0.1
    return (w1, b1, w2, b2, w3, b3)


def prepare_params(params):
    """One-time preprocessing: transpose weights (feature-major kernel layout)
    and zero-pad hidden 100 -> 128.  Zero-padded hidden rows/cols pass through
    ReLU and the final matmul as exact zeros, so results match the unpadded
    math up to accumulation order."""
    w1, b1, w2, b2, w3, b3 = params
    pad_h = HIDDEN_PAD - HIDDEN
    w1t = jnp.pad(w1.astype(jnp.float32).T, ((0, pad_h), (0, 0)))          # (128, 6)
    b1t = jnp.pad(b1.astype(jnp.float32), (0, pad_h)).reshape(HIDDEN_PAD, 1)
    w2t = jnp.pad(w2.astype(jnp.float32).T, ((0, pad_h), (0, pad_h)))      # (128, 128)
    b2t = jnp.pad(b2.astype(jnp.float32), (0, pad_h)).reshape(HIDDEN_PAD, 1)
    w3t = jnp.pad(w3.astype(jnp.float32).T, ((0, 0), (0, pad_h)))          # (3, 128)
    b3t = b3.astype(jnp.float32).reshape(STATE_DIM, 1)
    return (w1t, b1t, w2t, b2t, w3t, b3t)


def _reference_forward(state, action, params):
    w1, b1, w2, b2, w3, b3 = params
    x = jnp.concatenate([state, action], axis=-1)
    h1 = jnp.maximum(x @ w1 + b1, 0.0)
    h2 = jnp.maximum(h1 @ w2 + b2, 0.0)
    return h2 @ w3 + b3


if __name__ == "__main__":
    key = jax.random.PRNGKey(0)
    kp, ks, ka = jax.random.split(key, 3)

    params = init_params(kp)
    prepared = prepare_params(params)

    # Small example inputs with leading dims (..., dim): (2, 8, state/action_dim)
    state = jax.random.normal(ks, (2, 8, STATE_DIM), jnp.float32)
    action = jax.random.normal(ka, (2, 8, ACTION_DIM), jnp.float32)

    out = absolute_dynamics_forward(state, action, prepared)
    out = jax.block_until_ready(out)

    ref = _reference_forward(state, action, params)
    assert out.shape == (2, 8, STATE_DIM), out.shape
    assert jnp.allclose(out, ref, atol=5e-4, rtol=5e-4), "mismatch vs JAX reference"

    print("KERNEL_OK")
</pallas_src>

<mosaic_0001>
module attributes {stable_mosaic.version = 11 : i64} {
  func.func @_mlp_kernel(%arg0: i32, %arg1: memref<6x16xf32, #tpu.memory_space<vmem>>, %arg2: memref<128x6xf32, #tpu.memory_space<vmem>>, %arg3: memref<128x1xf32, #tpu.memory_space<vmem>>, %arg4: memref<128x128xf32, #tpu.memory_space<vmem>>, %arg5: memref<128x1xf32, #tpu.memory_space<vmem>>, %arg6: memref<3x128xf32, #tpu.memory_space<vmem>>, %arg7: memref<3x1xf32, #tpu.memory_space<vmem>>, %arg8: memref<3x16xf32, #tpu.memory_space<vmem>>) attributes {dimension_semantics = [#tpu.dimension_semantics<parallel>], iteration_bounds = array<i64: 1>, scalar_prefetch = 0 : i64, scratch_operands = 0 : i64, tpu.core_type = #tpu.core_type<tc>, window_params = [{transform_indices = @transform_0, window_bounds = array<i64: 6, 16>}, {pipeline_mode = #tpu.pipeline_mode<synchronous>, transform_indices = @transform_1, window_bounds = array<i64: 128, 6>}, {pipeline_mode = #tpu.pipeline_mode<synchronous>, transform_indices = @transform_2, window_bounds = array<i64: 128, 1>}, {pipeline_mode = #tpu.pipeline_mode<synchronous>, transform_indices = @transform_3, window_bounds = array<i64: 128, 128>}, {pipeline_mode = #tpu.pipeline_mode<synchronous>, transform_indices = @transform_4, window_bounds = array<i64: 128, 1>}, {pipeline_mode = #tpu.pipeline_mode<synchronous>, transform_indices = @transform_5, window_bounds = array<i64: 3, 128>}, {pipeline_mode = #tpu.pipeline_mode<synchronous>, transform_indices = @transform_6, window_bounds = array<i64: 3, 1>}, {transform_indices = @transform_7, window_bounds = array<i64: 3, 16>}]} {
    %c0 = arith.constant 0 : index
    %c0_0 = arith.constant 0 : index
    %0 = vector.load %arg1[%c0, %c0_0] : memref<6x16xf32, #tpu.memory_space<vmem>>, vector<6x16xf32>
    %c0_1 = arith.constant 0 : index
    %c0_2 = arith.constant 0 : index
    %1 = vector.load %arg2[%c0_1, %c0_2] : memref<128x6xf32, #tpu.memory_space<vmem>>, vector<128x6xf32>
    %cst = arith.constant dense<0.000000e+00> : vector<128x16xf32>
    %2 = tpu.matmul %1, %0, %cst {dimension_numbers = #tpu.dot_dimension_numbers<[1], [0], [0], [1], [0, 0, 1, 1], [], []>} : vector<128x6xf32>, vector<6x16xf32>, vector<128x16xf32> -> vector<128x16xf32>
    %c0_3 = arith.constant 0 : index
    %c0_4 = arith.constant 0 : index
    %3 = vector.load %arg3[%c0_3, %c0_4] : memref<128x1xf32, #tpu.memory_space<vmem>>, vector<128x1xf32>
    %4 = vector.broadcast %3 : vector<128x1xf32> to vector<128x16xf32>
    %5 = arith.addf %2, %4 : vector<128x16xf32>
    %cst_5 = arith.constant 0.000000e+00 : f32
    %6 = vector.broadcast %cst_5 : f32 to vector<128x16xf32>
    %7 = arith.maximumf %5, %6 : vector<128x16xf32>
    %c0_6 = arith.constant 0 : index
    %c0_7 = arith.constant 0 : index
    %8 = vector.load %arg4[%c0_6, %c0_7] : memref<128x128xf32, #tpu.memory_space<vmem>>, vector<128x128xf32>
    %cst_8 = arith.constant dense<0.000000e+00> : vector<128x16xf32>
    %9 = tpu.matmul %8, %7, %cst_8 {dimension_numbers = #tpu.dot_dimension_numbers<[1], [0], [0], [1], [0, 0, 1, 1], [], []>} : vector<128x128xf32>, vector<128x16xf32>, vector<128x16xf32> -> vector<128x16xf32>
    %c0_9 = arith.constant 0 : index
    %c0_10 = arith.constant 0 : index
    %10 = vector.load %arg5[%c0_9, %c0_10] : memref<128x1xf32, #tpu.memory_space<vmem>>, vector<128x1xf32>
    %11 = vector.broadcast %10 : vector<128x1xf32> to vector<128x16xf32>
    %12 = arith.addf %9, %11 : vector<128x16xf32>
    %cst_11 = arith.constant 0.000000e+00 : f32
    %13 = vector.broadcast %cst_11 : f32 to vector<128x16xf32>
    %14 = arith.maximumf %12, %13 : vector<128x16xf32>
    %c0_12 = arith.constant 0 : index
    %c0_13 = arith.constant 0 : index
    %15 = vector.load %arg6[%c0_12, %c0_13] : memref<3x128xf32, #tpu.memory_space<vmem>>, vector<3x128xf32>
    %cst_14 = arith.constant dense<0.000000e+00> : vector<3x16xf32>
    %16 = tpu.matmul %15, %14, %cst_14 {dimension_numbers = #tpu.dot_dimension_numbers<[1], [0], [0], [1], [0, 0, 1, 1], [], []>} : vector<3x128xf32>, vector<128x16xf32>, vector<3x16xf32> -> vector<3x16xf32>
    %c0_15 = arith.constant 0 : index
    %c0_16 = arith.constant 0 : index
    %17 = vector.load %arg7[%c0_15, %c0_16] : memref<3x1xf32, #tpu.memory_space<vmem>>, vector<3x1xf32>
    %18 = vector.broadcast %17 : vector<3x1xf32> to vector<3x16xf32>
    %19 = arith.addf %16, %18 : vector<3x16xf32>
    %c0_17 = arith.constant 0 : index
    %c0_18 = arith.constant 0 : index
    %20 = vector.load %arg8[%c0_17, %c0_18] : memref<3x16xf32, #tpu.memory_space<vmem>>, vector<3x16xf32>
    tpu.vector_store %arg8[%c0_17, %c0_18], %19 {strides = array<i32>} : memref<3x16xf32, #tpu.memory_space<vmem>>, vector<3x16xf32>,
    return
  }
  func.func @transform_0(%arg0: i32) -> (i32, i32) {
    %c0_i32 = arith.constant 0 : i32
    %c0_i32_0 = arith.constant 0 : i32
    return %c0_i32, %arg0 : i32, i32
  }
  func.func @transform_1(%arg0: i32) -> (i32, i32) {
    %c0_i32 = arith.constant 0 : i32
    %c0_i32_0 = arith.constant 0 : i32
    %c0_i32_1 = arith.constant 0 : i32
    return %c0_i32, %c0_i32_0 : i32, i32
  }
  func.func @transform_2(%arg0: i32) -> (i32, i32) {
    %c0_i32 = arith.constant 0 : i32
    %c0_i32_0 = arith.constant 0 : i32
    %c0_i32_1 = arith.constant 0 : i32
    return %c0_i32, %c0_i32_0 : i32, i32
  }
  func.func @transform_3(%arg0: i32) -> (i32, i32) {
    %c0_i32 = arith.constant 0 : i32
    %c0_i32_0 = arith.constant 0 : i32
    %c0_i32_1 = arith.constant 0 : i32
    return %c0_i32, %c0_i32_0 : i32, i32
  }
  func.func @transform_4(%arg0: i32) -> (i32, i32) {
    %c0_i32 = arith.constant 0 : i32
    %c0_i32_0 = arith.constant 0 : i32
    %c0_i32_1 = arith.constant 0 : i32
    return %c0_i32, %c0_i32_0 : i32, i32
  }
  func.func @transform_5(%arg0: i32) -> (i32, i32) {
    %c0_i32 = arith.constant 0 : i32
    %c0_i32_0 = arith.constant 0 : i32
    %c0_i32_1 = arith.constant 0 : i32
    return %c0_i32, %c0_i32_0 : i32, i32
  }
  func.func @transform_6(%arg0: i32) -> (i32, i32) {
    %c0_i32 = arith.constant 0 : i32
    %c0_i32_0 = arith.constant 0 : i32
    %c0_i32_1 = arith.constant 0 : i32
    return %c0_i32, %c0_i32_0 : i32, i32
  }
  func.func @transform_7(%arg0: i32) -> (i32, i32) {
    %c0_i32 = arith.constant 0 : i32
    %c0_i32_0 = arith.constant 0 : i32
    return %c0_i32, %arg0 : i32, i32
  }
}

</mosaic_0001>

<bundles_post_ra>
// kernel: absolute_dynamics_forward.1
= control target key start
LH: loop header
LB: loop body
LE: loop exit
PB: predicated region body
PF: predicated region fallthrough
CT: control target
= control target key end

     0   :  { %vm188_vm0 = vcmask 1045504   ;;  %vm139_vm1 = vcmask 48128   ;;  %v971_v3 = vmov 0   ;;  %vm973_vm2 = vmmov 0   ;;  %s1243_s0 = inlined_call_operand.vmem [shape: f32[6,16], index: 0, kind: input, shape index: {}]   ;;  %s1244_s1 = inlined_call_operand.vmem [shape: f32[128,6], index: 1, kind: input, shape index: {}]   ;;  %s1245_s2 = inlined_call_operand.vmem [shape: f32[128,1], index: 2, kind: input, shape index: {}]   ;;  %s1246_s4 = inlined_call_operand.vmem [shape: f32[128,1], index: 4, kind: input, shape index: {}]   ;;  %s1247_s6 = inlined_call_operand.vmem [shape: f32[3,1], index: 6, kind: input, shape index: {}]   ;;  %s1248_s3 = inlined_call_operand.vmem [shape: f32[128,128], index: 3, kind: input, shape index: {}]   ;;  %s1249_s5 = inlined_call_operand.vmem [shape: f32[3,128], index: 5, kind: input, shape index: {}]   ;;  %s1250_s7 = inlined_call_operand.vmem [shape: f32[3,16], index: 7, kind: output, shape index: {}]  }
   0x1   :  { %v26_v0 = vld [vmem:[%s1243_s0] sm:$0x3f]  ;;  %v28_v2 = vld [vmem:[%s1244_s1 + $0x8] sm:$0xff]  ;;  %969 = vset.pattern.permute.xlu0 %v971_v3  ;;  %970 = vset.pattern.permute.xlu1 %v971_v3  ;;  %v29_v4 = vld [vmem:[%s1244_s1 + $0x10] sm:$0xff]  ;;  %vm703_vm3 = vcmask 124928  }
   0x2   :  { %v27_v1 = vld [vmem:[%s1244_s1] sm:$0xff]  ;;  %792 = vmatprep.subr.msk.mxu0 %vm188_vm0, %v26_v0  ;;  %v30_v6 = vld [vmem:[%s1244_s1 + $0x18] sm:$0xff]  ;;  %v44_v8 = vld [vmem:[%s1245_s2 + $0x8] sm:$0xff] }
   0x3   :  { %794 = vmatprep.mubr.msk.f32.mxu0 %vm139_vm1, %v27_v1  ;;  %793 = vmatpush3.msk.msra.mxu0 %vm188_vm0, %v26_v0  ;;  %v43_v5 = vld [vmem:[%s1245_s2] sm:$0xff]  ;;  %v45_v9 = vld [vmem:[%s1245_s2 + $0x10] sm:$0xff]  ;;  %v46_v10 = vld [vmem:[%s1245_s2 + $0x18] sm:$0xff] }
   0x4   :  { %795 = vmatmul.mubr.msk.f32.vlgmr.msra.gmra.mrb[0].mxu0 %vm139_vm1, %v28_v2  ;;  %61 = vperm.xlu0 %969, %v43_v5   ;;  %v31_v7 = vld [vmem:[%s1244_s1 + $0x20] sm:$0xff]  ;;  %v32_v11 = vld [vmem:[%s1244_s1 + $0x28] sm:$0xff]  ;;  %v33_v12 = vld [vmem:[%s1244_s1 + $0x30] sm:$0xff] }
   0x5   :  { %797 = vmatprep.mubr.msk.f32.mxu0 %vm139_vm1, %v29_v4  ;;  %71 = vperm.xlu1 %970, %v45_v9   ;;  %v47_v13 = vld [vmem:[%s1245_s2 + $0x20] sm:$0xff]  ;;  %v48_v14 = vld [vmem:[%s1245_s2 + $0x28] sm:$0xff]  ;;  %v34_v15 = vld [vmem:[%s1244_s1 + $0x38] sm:$0xff] }
   0x6   :  { %v35_v16 = vld [vmem:[%s1244_s1 + $0x40] sm:$0xff]  ;;  %v49_v17 = vld [vmem:[%s1245_s2 + $0x30] sm:$0xff]  ;;  %v50_v18 = vld [vmem:[%s1245_s2 + $0x38] sm:$0xff] }
   0x7   :  { %v36_v19 = vld [vmem:[%s1244_s1 + $0x48] sm:$0xff]  ;;  %v37_v20 = vld [vmem:[%s1244_s1 + $0x50] sm:$0xff]  ;;  %v51_v21 = vld [vmem:[%s1245_s2 + $0x40] sm:$0xff] }
   0x8   :  { %798 = vmatmul.mubr.msk.f32.gmra.mrb[2].mxu0 %vm139_vm1, %v30_v6  ;;  %66 = vperm.xlu0 %969, %v44_v8   ;;  %v52_v22 = vld [vmem:[%s1245_s2 + $0x48] sm:$0xff]  ;;  %v38_v23 = vld [vmem:[%s1244_s1 + $0x58] sm:$0xff]  ;;  %v39_v24 = vld [vmem:[%s1244_s1 + $0x60] sm:$0xff] }
   0x9   :  { %800 = vmatprep.mubr.msk.f32.mxu0 %vm139_vm1, %v31_v7  ;;  %76 = vperm.xlu1 %970, %v46_v10   ;;  %v53_v25 = vld [vmem:[%s1245_s2 + $0x50] sm:$0xff]  ;;  %v54_v26 = vld [vmem:[%s1245_s2 + $0x58] sm:$0xff]  ;;  %v40_v27 = vld [vmem:[%s1244_s1 + $0x68] sm:$0xff] }
   0xa   :  { %v41_v28 = vld [vmem:[%s1244_s1 + $0x70] sm:$0xff]  ;;  %v55_v29 = vld [vmem:[%s1245_s2 + $0x60] sm:$0xff]  ;;  %v56_v30 = vld [vmem:[%s1245_s2 + $0x68] sm:$0xff] }
   0xb   :  { %v42_v31 = vld [vmem:[%s1244_s1 + $0x78] sm:$0xff]  ;;  %v57_v32 = vld [vmem:[%s1245_s2 + $0x70] sm:$0xff]  ;;  %v369_v34 = vld [vmem:[%s1246_s4] sm:$0xff] }
   0xc   :  { %801 = vmatmul.mubr.msk.f32.gmra.mrb[4].mxu0 %vm139_vm1, %v32_v11  ;;  %81 = vperm.xlu0 %969, %v47_v13   ;;  %v58_v33 = vld [vmem:[%s1245_s2 + $0x78] sm:$0xff]  ;;  %v370_v35 = vld [vmem:[%s1246_s4 + $0x8] sm:$0xff]  ;;  %v371_v36 = vld [vmem:[%s1246_s4 + $0x10] sm:$0xff] }
   0xd   :  { %803 = vmatprep.mubr.msk.f32.mxu0 %vm139_vm1, %v33_v12  ;;  %86 = vperm.xlu1 %970, %v48_v14   ;;  %v372_v37 = vld [vmem:[%s1246_s4 + $0x18] sm:$0xff]  ;;  %v373_v38 = vld [vmem:[%s1246_s4 + $0x20] sm:$0xff]  ;;  %v374_v39 = vld [vmem:[%s1246_s4 + $0x28] sm:$0xff] }
   0xe   :  { %v375_v40 = vld [vmem:[%s1246_s4 + $0x30] sm:$0xff]  ;;  %v376_v41 = vld [vmem:[%s1246_s4 + $0x38] sm:$0xff]  ;;  %v377_v42 = vld [vmem:[%s1246_s4 + $0x40] sm:$0xff] }
   0xf   :  { %v378_v43 = vld [vmem:[%s1246_s4 + $0x48] sm:$0xff]  ;;  %v379_v44 = vld [vmem:[%s1246_s4 + $0x50] sm:$0xff]  ;;  %v380_v45 = vld [vmem:[%s1246_s4 + $0x58] sm:$0xff] }
  0x10   :  { %804 = vmatmul.mubr.msk.f32.gmra.mrb[6].mxu0 %vm139_vm1, %v34_v15  ;;  %91 = vperm.xlu0 %969, %v49_v17   ;;  %v381_v46 = vld [vmem:[%s1246_s4 + $0x60] sm:$0xff]  ;;  %v382_v47 = vld [vmem:[%s1246_s4 + $0x68] sm:$0xff]  ;;  %v383_v48 = vld [vmem:[%s1246_s4 + $0x70] sm:$0xff] }
  0x11   :  { %806 = vmatprep.mubr.msk.f32.mxu0 %vm139_vm1, %v35_v16  ;;  %96 = vperm.xlu1 %970, %v50_v18   ;;  %v384_v49 = vld [vmem:[%s1246_s4 + $0x78] sm:$0xff]  ;;  %v627_v50 = vld [vmem:[%s1247_s6] sm:$0x7] }
  0x12   :  { %v353_v51 = vld [vmem:[%s1248_s3] sm:$0xff] }
  0x13   :  { %850 = vmatprep.mubr.f32.mxu1 %v353_v51 }
  0x14   :  { %807 = vmatmul.mubr.msk.f32.gmra.mrb[8].mxu0 %vm139_vm1, %v36_v19  ;;  %101 = vperm.xlu0 %969, %v51_v21  }
  0x15   :  { %809 = vmatprep.mubr.msk.f32.mxu0 %vm139_vm1, %v37_v20  ;;  %106 = vperm.xlu1 %970, %v52_v22  }
  0x18   :  { %810 = vmatmul.mubr.msk.f32.gmra.mrb[10].mxu0 %vm139_vm1, %v38_v23  ;;  %111 = vperm.xlu0 %969, %v53_v25  }
  0x19   :  { %812 = vmatprep.mubr.msk.f32.mxu0 %vm139_vm1, %v39_v24  ;;  %116 = vperm.xlu1 %970, %v54_v26  }
  0x1c   :  { %813 = vmatmul.mubr.msk.f32.gmra.mrb[12].mxu0 %vm139_vm1, %v40_v27  ;;  %121 = vperm.xlu0 %969, %v55_v29  }
  0x1d   :  { %815 = vmatprep.mubr.msk.f32.mxu0 %vm139_vm1, %v41_v28  ;;  %126 = vperm.xlu1 %970, %v56_v30  }
  0x20   :  { %816 = vmatmul.mubr.msk.f32.gmra.mrb[14].mxu0 %vm139_vm1, %v42_v31  ;;  %131 = vperm.xlu0 %969, %v57_v32  }
  0x21   :  { %136 = vperm.xlu1 %970, %v58_v33  }
  0x24   :  { %387 = vperm.xlu0 %969, %v369_v34  }
  0x25   :  { %392 = vperm.xlu1 %970, %v370_v35  }
  0x28   :  { %397 = vperm.xlu0 %969, %v371_v36  }
  0x29   :  { %402 = vperm.xlu1 %970, %v372_v37  }
  0x2c   :  { %407 = vperm.xlu0 %969, %v373_v38  }
  0x2d   :  { %412 = vperm.xlu1 %970, %v374_v39  }
  0x30   :  { %417 = vperm.xlu0 %969, %v375_v40  }
  0x31   :  { %422 = vperm.xlu1 %970, %v376_v41  }
  0x34   :  { %427 = vperm.xlu0 %969, %v377_v42  }
  0x35   :  { %432 = vperm.xlu1 %970, %v378_v43  }
  0x38   :  { %437 = vperm.xlu0 %969, %v379_v44  }
  0x39   :  { %442 = vperm.xlu1 %970, %v380_v45  }
  0x3c   :  { %447 = vperm.xlu0 %969, %v381_v46  }
  0x3d   :  { %452 = vperm.xlu1 %970, %v382_v47  }
  0x40   :  { %457 = vperm.xlu0 %969, %v383_v48  }
  0x41   :  { %462 = vperm.xlu1 %970, %v384_v49  }
  0x44   :  { %630 = vperm.xlu0 %969, %v627_v50  }
  0x83   :  { %v62_v53 = vpop.permute.xlu0 %61 }
  0x84   :  { %v72_v52 = vpop.permute.xlu1 %71 }
  0x87   :  { %v67_v55 = vpop.permute.xlu0 %66 }
  0x88   :  { %v77_v54 = vpop.permute.xlu1 %76 }
  0x8b   :  { %v82_v57 = vpop.permute.xlu0 %81 }
  0x8c   :  { %v87_v56 = vpop.permute.xlu1 %86 }
  0x8f   :  { %v92_v2 = vpop.permute.xlu0 %91 }
  0x90   :  { %v97_v63 = vpop.permute.xlu1 %96 }
  0x93   :  { %v102_v15 = vpop.permute.xlu0 %101 }
  0x94   :  { %v107_v12 = vpop.permute.xlu1 %106 }
  0x97   :  { %v112_v27 = vpop.permute.xlu0 %111 }
  0x98   :  { %v117_v24 = vpop.permute.xlu1 %116 }
  0x9b   :  { %v122_v40 = vpop.permute.xlu0 %121 }
  0x9c   :  { %v127_v37 = vpop.permute.xlu1 %126 }
  0xa0   :  { %v137_v49 = vpop.permute.xlu1 %136 }
  0xd7   :  { %v796_v58 = vpop.f32.mrb[0].mxu0 }
  0xd8   :  { %v264_v59 = vadd.f32 %v796_v58, %v67_v55  ;;  %v258_v60 = vpop.f32.mrb[1].mxu0 }
  0xd9   :  { %v259_v61 = vadd.f32 %v258_v60, %v62_v53  ;;  %v354_v60 = vld [vmem:[%s1248_s3 + $0x8] sm:$0xff] }
  0xda   :  { %v338_v62 = vmax.f32 %v264_v59, 0.0 }
  0xdb   :  { %v337_v0 = vmax.f32 %v259_v61, 0.0  ;;  %v799_v1 = vpop.f32.mrb[2].mxu0  ;;  %v355_v61 = vld [vmem:[%s1248_s3 + $0x10] sm:$0xff] }
  0xdc   :  { %v274_v3 = vadd.f32 %v799_v1, %v77_v54  ;;  %v268_v4 = vpop.f32.mrb[3].mxu0  ;;  %v359_v1 = vld [vmem:[%s1248_s3 + $0x30] sm:$0xff] }
  0xdd   :  { %v269_v5 = vadd.f32 %v268_v4, %v72_v52  ;;  %v909_v6 = vpack.c.bf16 %v338_v62, %v337_v0  ;;  %v132_v52 = vpop.permute.xlu0 %131  ;;  %v356_v62 = vld [vmem:[%s1248_s3 + $0x18] sm:$0xff]  ;;  %v358_v0 = vld [vmem:[%s1248_s3 + $0x28] sm:$0xff] }
  0xde   :  { %v340_v7 = vmax.f32 %v274_v3, 0.0  ;;  %v361_v3 = vld [vmem:[%s1248_s3 + $0x40] sm:$0xff]  ;;  %v362_v4 = vld [vmem:[%s1248_s3 + $0x48] sm:$0xff] }
  0xdf   :  { %v339_v8 = vmax.f32 %v269_v5, 0.0  ;;  %v802_v9 = vpop.f32.mrb[4].mxu0  ;;  %910 = vmatprep.subr.bf16.mxu1 %v909_v6  ;;  %v363_v5 = vld [vmem:[%s1248_s3 + $0x50] sm:$0xff] }
  0xe0   :  { %v284_v10 = vadd.f32 %v802_v9, %v87_v56  ;;  %v278_v11 = vpop.f32.mrb[5].mxu0  ;;  %912 = vmatpush3.bf16.msra.mxu1 %v909_v6  ;;  %v364_v6 = vld [vmem:[%s1248_s3 + $0x58] sm:$0xff]  ;;  %v367_v9 = vld [vmem:[%s1248_s3 + $0x70] sm:$0xff] }
  0xe1   :  { %v913_v13 = vpack.c.bf16 %v340_v7, %v339_v8  ;;  %v279_v14 = vadd.f32 %v278_v11, %v82_v57  ;;  %v365_v7 = vld [vmem:[%s1248_s3 + $0x60] sm:$0xff]  ;;  %v366_v8 = vld [vmem:[%s1248_s3 + $0x68] sm:$0xff]  ;;  %v972_v11 = vmov 0.0|0.0  }
  0xe2   :  { %v342_v16 = vmax.f32 %v284_v10, 0.0  ;;  %v368_v10 = vld [vmem:[%s1248_s3 + $0x78] sm:$0xff]  ;;  %941 = vmatprep.subr.bf16.mxu0 %v972_v11 }
  0xe3   :  { %v341_v17 = vmax.f32 %v279_v14, 0.0  ;;  %v805_v18 = vpop.f32.mrb[6].mxu0  ;;  %914 = vmatprep.subr.bf16.mxu1 %v913_v13  ;;  %v388_v14 = vpop.permute.xlu0 %387 }
  0xe4   :  { %v294_v19 = vadd.f32 %v805_v18, %v97_v63  ;;  %v288_v20 = vpop.f32.mrb[7].mxu0  ;;  %916 = vmatpush3.bf16.msra.mxu1 %v913_v13  ;;  %v357_v63 = vld [vmem:[%s1248_s3 + $0x20] sm:$0xff]  ;;  %v393_v13 = vpop.permute.xlu1 %392 }
  0xe5   :  { %v917_v21 = vpack.c.bf16 %v342_v16, %v341_v17  ;;  %v289_v22 = vadd.f32 %v288_v20, %v92_v2  ;;  %v360_v2 = vld [vmem:[%s1248_s3 + $0x38] sm:$0xff] }
  0xe6   :  { %v344_v23 = vmax.f32 %v294_v19, 0.0 }
  0xe7   :  { %v343_v25 = vmax.f32 %v289_v22, 0.0  ;;  %v808_v26 = vpop.f32.mrb[8].mxu0  ;;  %918 = vmatprep.subr.bf16.mxu1 %v917_v21  ;;  %v398_v16 = vpop.permute.xlu0 %397 }
  0xe8   :  { %v304_v28 = vadd.f32 %v808_v26, %v107_v12  ;;  %v298_v29 = vpop.f32.mrb[9].mxu0  ;;  %920 = vmatpush3.bf16.msra.mxu1 %v917_v21  ;;  %v974_v12 = vmov 0.0  }
  0xe9   :  { %v921_v30 = vpack.c.bf16 %v344_v23, %v343_v25  ;;  %v299_v31 = vadd.f32 %v298_v29, %v102_v15  ;;  %906 = vmatprep.mubr.msk.f32.mxu0 %vm973_vm2, %v974_v12  ;;  %v403_v15 = vpop.permute.xlu1 %402 }
  0xea   :  { %v346_v32 = vmax.f32 %v304_v28, 0.0 }
  0xeb   :  { %v345_v33 = vmax.f32 %v299_v31, 0.0  ;;  %v811_v34 = vpop.f32.mrb[10].mxu0  ;;  %922 = vmatprep.subr.bf16.mxu1 %v921_v30  ;;  %v408_v18 = vpop.permute.xlu0 %407 }
  0xec   :  { %v314_v35 = vadd.f32 %v811_v34, %v117_v24  ;;  %v308_v36 = vpop.f32.mrb[11].mxu0  ;;  %924 = vmatpush3.bf16.msra.mxu1 %v921_v30 }
  0xed   :  { %v925_v38 = vpack.c.bf16 %v346_v32, %v345_v33  ;;  %v309_v39 = vadd.f32 %v308_v36, %v112_v27  ;;  %v413_v17 = vpop.permute.xlu1 %412 }
  0xee   :  { %v348_v41 = vmax.f32 %v314_v35, 0.0 }
  0xef   :  { %v347_v42 = vmax.f32 %v309_v39, 0.0  ;;  %v814_v43 = vpop.f32.mrb[12].mxu0  ;;  %926 = vmatprep.subr.bf16.mxu1 %v925_v38  ;;  %v418_v27 = vpop.permute.xlu0 %417 }
  0xf0   :  { %v324_v44 = vadd.f32 %v814_v43, %v127_v37  ;;  %v318_v45 = vpop.f32.mrb[13].mxu0  ;;  %928 = vmatpush3.bf16.msra.mxu1 %v925_v38 }
  0xf1   :  { %v929_v46 = vpack.c.bf16 %v348_v41, %v347_v42  ;;  %v319_v47 = vadd.f32 %v318_v45, %v122_v40  ;;  %v423_v24 = vpop.permute.xlu1 %422 }
  0xf2   :  { %v350_v48 = vmax.f32 %v324_v44, 0.0 }
  0xf3   :  { %v349_v50 = vmax.f32 %v319_v47, 0.0  ;;  %v817_v51 = vpop.f32.mrb[14].mxu0  ;;  %930 = vmatprep.subr.bf16.mxu1 %v929_v46  ;;  %v428_v40 = vpop.permute.xlu0 %427 }
  0xf4   :  { %v334_v53 = vadd.f32 %v817_v51, %v137_v49  ;;  %v328_v54 = vpop.f32.mrb[15].mxu0  ;;  %932 = vmatpush3.bf16.msra.mxu1 %v929_v46 }
  0xf5   :  { %v933_v55 = vpack.c.bf16 %v350_v48, %v349_v50  ;;  %v329_v56 = vadd.f32 %v328_v54, %v132_v52  ;;  %v433_v37 = vpop.permute.xlu1 %432 }
  0xf6   :  { %v352_v57 = vmax.f32 %v334_v53, 0.0 }
  0xf7   :  { %v351_v58 = vmax.f32 %v329_v56, 0.0  ;;  %934 = vmatprep.subr.bf16.mxu1 %v933_v55  ;;  %v438_v52 = vpop.permute.xlu0 %437 }
  0xf8   :  { %936 = vmatpush3.bf16.msra.mxu1 %v933_v55 }
  0xf9   :  { %v937_v59 = vpack.c.bf16 %v352_v57, %v351_v58  ;;  %v443_v49 = vpop.permute.xlu1 %442 }
  0xfb   :  { %938 = vmatprep.subr.bf16.mxu1 %v937_v59 }
  0xfc   :  { %940 = vmatpush3.bf16.msra.mxu1 %v937_v59 }
  0xff   :  { %851 = vmatmul.mubr.f32.vlgmr.msra.gmra.mrb[0].mxu1 %v354_v60 }
 0x100   :  { %853 = vmatprep.mubr.f32.mxu1 %v355_v61 }
 0x103   :  { %854 = vmatmul.mubr.f32.gmra.mrb[2].mxu1 %v356_v62  ;;  %v453_v62 = vpop.permute.xlu1 %452 }
 0x104   :  { %856 = vmatprep.mubr.f32.mxu1 %v357_v63 }
 0x107   :  { %857 = vmatmul.mubr.f32.gmra.mrb[4].mxu1 %v358_v0 }
 0x108   :  { %859 = vmatprep.mubr.f32.mxu1 %v359_v1  ;;  %v448_v1 = vpop.permute.xlu0 %447 }
 0x10b   :  { %860 = vmatmul.mubr.f32.gmra.mrb[6].mxu1 %v360_v2 }
 0x10c   :  { %862 = vmatprep.mubr.f32.mxu1 %v361_v3 }
 0x10f   :  { %863 = vmatmul.mubr.f32.gmra.mrb[8].mxu1 %v362_v4 }
 0x110   :  { %865 = vmatprep.mubr.f32.mxu1 %v363_v5 }
 0x113   :  { %866 = vmatmul.mubr.f32.gmra.mrb[10].mxu1 %v364_v6 }
 0x114   :  { %868 = vmatprep.mubr.f32.mxu1 %v365_v7 }
 0x117   :  { %869 = vmatmul.mubr.f32.gmra.mrb[12].mxu1 %v366_v8 }
 0x118   :  { %871 = vmatprep.mubr.f32.mxu1 %v367_v9 }
 0x11b   :  { %872 = vmatmul.mubr.f32.gmra.mrb[14].mxu1 %v368_v10  ;;  %v463_v10 = vpop.permute.xlu1 %462 }
 0x1d2   :  { %v852_v19 = vpop.f32.mrb[0].mxu1 }
 0x1d3   :  { %v537_v20 = vadd.f32 %v852_v19, %v393_v13  ;;  %v531_v21 = vpop.f32.mrb[1].mxu1 }
 0x1d4   :  { %v532_v22 = vadd.f32 %v531_v21, %v388_v14  ;;  %v458_v14 = vpop.permute.xlu0 %457 }
 0x1d5   :  { %v611_v23 = vmax.f32 %v537_v20, 0.0 }
 0x1d6   :  { %v610_v25 = vmax.f32 %v532_v22, 0.0  ;;  %v855_v26 = vpop.f32.mrb[2].mxu1  ;;  %v626_v22 = vld [vmem:[%s1249_s5] sm:$0x7] }
 0x1d7   :  { %v547_v28 = vadd.f32 %v855_v26, %v403_v15  ;;  %v541_v29 = vpop.f32.mrb[3].mxu1 }
 0x1d8   :  { %v942_v30 = vpack.c.bf16 %v611_v23, %v610_v25  ;;  %v542_v31 = vadd.f32 %v541_v29, %v398_v16  ;;  %v631_v23 = vpop.permute.xlu0 %630 }
 0x1d9   :  { %v613_v32 = vmax.f32 %v547_v28, 0.0 }
 0x1da   :  { %v612_v33 = vmax.f32 %v542_v31, 0.0  ;;  %v858_v34 = vpop.f32.mrb[4].mxu1  ;;  %943 = vmatpush3.bf16.msra.mxu0 %v942_v30 }
 0x1db   :  { %v557_v35 = vadd.f32 %v858_v34, %v413_v17  ;;  %v551_v36 = vpop.f32.mrb[5].mxu1  ;;  %944 = vmatprep.subr.bf16.mxu0 %v972_v11 }
 0x1dc   :  { %v945_v38 = vpack.c.bf16 %v613_v32, %v612_v33  ;;  %v552_v39 = vadd.f32 %v551_v36, %v408_v18 }
 0x1dd   :  { %v615_v41 = vmax.f32 %v557_v35, 0.0 }
 0x1de   :  { %v614_v42 = vmax.f32 %v552_v39, 0.0  ;;  %v861_v43 = vpop.f32.mrb[6].mxu1  ;;  %946 = vmatpush3.bf16.msra.mxu0 %v945_v38 }
 0x1df   :  { %v567_v44 = vadd.f32 %v861_v43, %v423_v24  ;;  %v561_v45 = vpop.f32.mrb[7].mxu1  ;;  %947 = vmatprep.subr.bf16.mxu0 %v972_v11 }
 0x1e0   :  { %v948_v46 = vpack.c.bf16 %v615_v41, %v614_v42  ;;  %v562_v47 = vadd.f32 %v561_v45, %v418_v27 }
 0x1e1   :  { %v617_v48 = vmax.f32 %v567_v44, 0.0 }
 0x1e2   :  { %v616_v50 = vmax.f32 %v562_v47, 0.0  ;;  %v864_v51 = vpop.f32.mrb[8].mxu1  ;;  %949 = vmatpush3.bf16.msra.mxu0 %v948_v46 }
 0x1e3   :  { %v577_v53 = vadd.f32 %v864_v51, %v433_v37  ;;  %v571_v54 = vpop.f32.mrb[9].mxu1  ;;  %950 = vmatprep.subr.bf16.mxu0 %v972_v11 }
 0x1e4   :  { %v951_v55 = vpack.c.bf16 %v617_v48, %v616_v50  ;;  %v572_v56 = vadd.f32 %v571_v54, %v428_v40 }
 0x1e5   :  { %v619_v57 = vmax.f32 %v577_v53, 0.0 }
 0x1e6   :  { %v618_v58 = vmax.f32 %v572_v56, 0.0  ;;  %v867_v59 = vpop.f32.mrb[10].mxu1  ;;  %952 = vmatpush3.bf16.msra.mxu0 %v951_v55 }
 0x1e7   :  { %v587_v60 = vadd.f32 %v867_v59, %v443_v49  ;;  %v581_v61 = vpop.f32.mrb[11].mxu1  ;;  %953 = vmatprep.subr.bf16.mxu0 %v972_v11 }
 0x1e8   :  { %v954_v63 = vpack.c.bf16 %v619_v57, %v618_v58  ;;  %v582_v0 = vadd.f32 %v581_v61, %v438_v52 }
 0x1e9   :  { %v621_v2 = vmax.f32 %v587_v60, 0.0 }
 0x1ea   :  { %v620_v3 = vmax.f32 %v582_v0, 0.0  ;;  %v870_v4 = vpop.f32.mrb[12].mxu1  ;;  %955 = vmatpush3.bf16.msra.mxu0 %v954_v63 }
 0x1eb   :  { %v597_v5 = vadd.f32 %v870_v4, %v453_v62  ;;  %v591_v6 = vpop.f32.mrb[13].mxu1  ;;  %956 = vmatprep.subr.bf16.mxu0 %v972_v11 }
 0x1ec   :  { %v957_v7 = vpack.c.bf16 %v621_v2, %v620_v3  ;;  %v592_v8 = vadd.f32 %v591_v6, %v448_v1 }
 0x1ed   :  { %v623_v9 = vmax.f32 %v597_v5, 0.0 }
 0x1ee   :  { %v622_v12 = vmax.f32 %v592_v8, 0.0  ;;  %v873_v13 = vpop.f32.mrb[14].mxu1  ;;  %958 = vmatpush3.bf16.msra.mxu0 %v957_v7 }
 0x1ef   :  { %v607_v15 = vadd.f32 %v873_v13, %v463_v10  ;;  %v601_v16 = vpop.f32.mrb[15].mxu1  ;;  %959 = vmatprep.subr.bf16.mxu0 %v972_v11 }
 0x1f0   :  { %v960_v17 = vpack.c.bf16 %v623_v9, %v622_v12  ;;  %v602_v18 = vadd.f32 %v601_v16, %v458_v14 }
 0x1f1   :  { %v625_v19 = vmax.f32 %v607_v15, 0.0 }
 0x1f2   :  { %v624_v20 = vmax.f32 %v602_v18, 0.0  ;;  %961 = vmatpush3.bf16.msra.mxu0 %v960_v17 }
 0x1f3   :  { %962 = vmatprep.subr.bf16.mxu0 %v972_v11 }
 0x1f4   :  { %v963_v21 = vpack.c.bf16 %v625_v19, %v624_v20 }
 0x1f6   :  { %964 = vmatpush3.bf16.msra.mxu0 %v963_v21 }
 0x1f9   :  { %907 = vmatmul.mubr.f32.vlgmr.msra.gmra.mrb[16].mxu0 %v626_v22 }
 0x2cc   :  { %v699_v24 = vpop.f32.mrb[16].mxu0 }
 0x2cd   :  { %v700_v25 = vadd.f32 %v699_v24, %v631_v23  ;;  %v908_v26 = vpop.f32.mrb[17].mxu0 }
 0x2cf   :  { %704 = vst.msk [vmem:[%s1250_s7] sm:$0x7] %vm703_vm3, %v700_v25 }

</bundles_post_ra>
